<compile_context>
chip_gen: v7x
topology: tpu7x:2x2x1
jax: 0.10.0
libtpu: 0.0.40
codegen_flags: <defaults>
</compile_context>

<pallas_src>
import functools

import jax
import jax.numpy as jnp
from jax.experimental import pallas as pl
from jax.experimental.pallas import tpu as pltpu


def _round_up(n, m):
    return ((n + m - 1) // m) * m


# ---------------------------------------------------------------------------
# Kernel 1: time-parallel input projection (one big GEMM over T*B rows)
#   gx = relu(x @ W_l^T + b_l) @ W_ih^T + (b_ih + b_hh)
# ---------------------------------------------------------------------------
def _proj_kernel(x_ref, wl_ref, bl_ref, wih_ref, bg_ref, gx_ref):
    x = x_ref[...].astype(wl_ref.dtype)
    y = jnp.dot(x, wl_ref[...], preferred_element_type=jnp.float32) + bl_ref[...]
    y = jnp.maximum(y, 0.0)                                   # ReLU
    g = jnp.dot(y.astype(wih_ref.dtype), wih_ref[...],
                preferred_element_type=jnp.float32) + bg_ref[...]
    gx_ref[...] = g.astype(gx_ref.dtype)


# ---------------------------------------------------------------------------
# Kernel 2: sequential LSTM recurrence; Tc timesteps per grid step.
# Grid = (batch_tiles, time_chunks); h/c carried in VMEM scratch across time.
# ---------------------------------------------------------------------------
def _lstm_recurrence_kernel(gx_ref, h0_ref, c0_ref, whh_ref,
                            out_ref, hout_ref, cout_ref,
                            h_st, c_st, *, seq_len, needs_mask):
    t_blk = pl.program_id(1)
    n_blk = pl.num_programs(1)
    Tc = gx_ref.shape[0]
    Hp = h_st.shape[1]

    @pl.when(t_blk == 0)
    def _():
        h_st[...] = h0_ref[...].astype(jnp.float32)
        c_st[...] = c0_ref[...].astype(jnp.float32)

    w_dtype = whh_ref.dtype

    def step(s, carry):
        # gates pre-activation: hoisted input part + recurrent matmul
        gates = gx_ref[s].astype(jnp.float32) + jnp.dot(
            h_st[...].astype(w_dtype), whh_ref[...],
            preferred_element_type=jnp.float32)                # (TB, 4*Hp)

        # PyTorch gate order i, f, g, o; each slice is lane-tile aligned (Hp % 128 == 0)
        i_g = jax.nn.sigmoid(gates[:, 0 * Hp:1 * Hp])
        f_g = jax.nn.sigmoid(gates[:, 1 * Hp:2 * Hp])
        g_g = jnp.tanh(gates[:, 2 * Hp:3 * Hp])
        o_g = jax.nn.sigmoid(gates[:, 3 * Hp:4 * Hp])

        c_new = f_g * c_st[...] + i_g * g_g
        h_new = o_g * jnp.tanh(c_new)

        if needs_mask:  # only traced when T was padded to a multiple of Tc
            valid = (t_blk * Tc + s) < seq_len
            h_new = jnp.where(valid, h_new, h_st[...])
            c_new = jnp.where(valid, c_new, c_st[...])

        h_st[...] = h_new
        c_st[...] = c_new
        out_ref[s] = h_new.astype(out_ref.dtype)
        return carry

    jax.lax.fori_loop(0, Tc, step, 0, unroll=True)

    # Resident outputs: only write on the final time chunk (saves vst slots).
    @pl.when(t_blk == n_blk - 1)
    def _():
        hout_ref[...] = h_st[...].astype(hout_ref.dtype)
        cout_ref[...] = c_st[...].astype(cout_ref.dtype)


# ---------------------------------------------------------------------------
# Wrapper
# ---------------------------------------------------------------------------
def mlp_lstm_forward(x, params, hidden_in=None, weight_dtype=jnp.bfloat16):
    """x: (B, T, D_in) float32 (batch_first, like the PyTorch module)."""
    B, T, D_in = x.shape
    H = params["W_l"].shape[0]
    f32 = jnp.float32

    if hidden_in is None:
        h0 = jnp.zeros((1, B, H), x.dtype)
        c0 = jnp.zeros((1, B, H), x.dtype)
        hidden_in = (h0, c0)
    h0, c0 = hidden_in

    # ---- padded / tiled sizes -------------------------------------------
    B_pad = _round_up(B, 8)            # sublane alignment
    H_pad = _round_up(H, 128)          # lane alignment (gate slices stay aligned)
    Tc = min(16, T)                    # timesteps per grid step
    T_pad = _round_up(T, Tc)
    needs_mask = (T_pad != T)

    # Megacore-friendly batch tiling (only the batch axis can be parallel).
    n_btiles = 2 if (B_pad % 16 == 0) else 1
    TB = B_pad // n_btiles
    n_tchunks = T_pad // Tc

    # ---- weight / bias prep (glue, plain JAX) ----------------------------
    wl_t = params["W_l"].T.astype(f32)                      # (D_in, H)
    wl_p = jnp.zeros((D_in, H_pad), f32).at[:, :H].set(wl_t).astype(weight_dtype)
    bl_p = jnp.zeros((1, H_pad), f32).at[0, :H].set(params["b_l"].astype(f32))

    wih_t = params["W_ih"].T.astype(f32)                    # (H, 4H), gate blocks [i|f|g|o]
    whh_t = params["W_hh"].T.astype(f32)                    # (H, 4H)
    bg = (params["b_ih"] + params["b_hh"]).astype(f32)      # (4H,)

    wih_p = jnp.zeros((H_pad, 4 * H_pad), f32)
    whh_p = jnp.zeros((H_pad, 4 * H_pad), f32)
    bg_p = jnp.zeros((1, 4 * H_pad), f32)
    for g in range(4):                                      # gate-blocked padding
        wih_p = wih_p.at[:H, g * H_pad:g * H_pad + H].set(wih_t[:, g * H:(g + 1) * H])
        whh_p = whh_p.at[:H, g * H_pad:g * H_pad + H].set(whh_t[:, g * H:(g + 1) * H])
        bg_p = bg_p.at[0, g * H_pad:g * H_pad + H].set(bg[g * H:(g + 1) * H])
    wih_p = wih_p.astype(weight_dtype)
    whh_p = whh_p.astype(weight_dtype)

    # ---- activations / state prep ----------------------------------------
    x_tbd = jnp.transpose(x, (1, 0, 2)).astype(f32)                        # (T, B, D_in)
    x_p = jnp.zeros((T_pad, B_pad, D_in), f32).at[:T, :B, :].set(x_tbd)
    x2 = x_p.reshape(T_pad * B_pad, D_in)                                  # (T_pad*B_pad, D_in)

    h0_p = jnp.zeros((B_pad, H_pad), f32).at[:B, :H].set(h0[0].astype(f32))
    c0_p = jnp.zeros((B_pad, H_pad), f32).at[:B, :H].set(c0[0].astype(f32))

    # ---- kernel 1: hoisted input projection -------------------------------
    TM = Tc * B_pad                     # row tile (multiple of 8, divides T_pad*B_pad)
    gx2 = pl.pallas_call(
        _proj_kernel,
        out_shape=jax.ShapeDtypeStruct((T_pad * B_pad, 4 * H_pad), f32),
        grid_spec=pltpu.PrefetchScalarGridSpec(
            num_scalar_prefetch=0,
            grid=(T_pad * B_pad // TM,),
            in_specs=[
                pl.BlockSpec((TM, D_in), lambda i: (i, 0)),          # x rows
                pl.BlockSpec((D_in, H_pad), lambda i: (0, 0)),       # W_l^T
                pl.BlockSpec((1, H_pad), lambda i: (0, 0)),          # b_l
                pl.BlockSpec((H_pad, 4 * H_pad), lambda i: (0, 0)),  # W_ih^T (gate-blocked)
                pl.BlockSpec((1, 4 * H_pad), lambda i: (0, 0)),      # b_ih + b_hh
            ],
            out_specs=pl.BlockSpec((TM, 4 * H_pad), lambda i: (i, 0)),
        ),
        compiler_params=pltpu.CompilerParams(
            dimension_semantics=("parallel",)),
    )(x2, wl_p, bl_p, wih_p, bg_p)
    gx = gx2.reshape(T_pad, B_pad, 4 * H_pad)                # free row-major reshape

    # ---- kernel 2: sequential recurrence ----------------------------------
    kernel = functools.partial(_lstm_recurrence_kernel,
                               seq_len=T, needs_mask=needs_mask)

    out_shapes = (
        jax.ShapeDtypeStruct((T_pad, B_pad, H_pad), x.dtype),   # per-step hidden outputs
        jax.ShapeDtypeStruct((B_pad, H_pad), x.dtype),          # h_T
        jax.ShapeDtypeStruct((B_pad, H_pad), x.dtype),          # c_T
    )

    grid_spec = pltpu.PrefetchScalarGridSpec(
        num_scalar_prefetch=0,
        grid=(n_btiles, n_tchunks),
        in_specs=[
            pl.BlockSpec((Tc, TB, 4 * H_pad), lambda b, t: (t, b, 0)),  # gx chunk
            pl.BlockSpec((TB, H_pad), lambda b, t: (b, 0)),             # h0
            pl.BlockSpec((TB, H_pad), lambda b, t: (b, 0)),             # c0
            pl.BlockSpec((H_pad, 4 * H_pad), lambda b, t: (0, 0)),      # W_hh^T (gate-blocked)
        ],
        out_specs=[
            pl.BlockSpec((Tc, TB, H_pad), lambda b, t: (t, b, 0)),      # out chunk
            pl.BlockSpec((TB, H_pad), lambda b, t: (b, 0)),             # h_T (resident)
            pl.BlockSpec((TB, H_pad), lambda b, t: (b, 0)),             # c_T (resident)
        ],
        scratch_shapes=[
            pltpu.VMEM((TB, H_pad), jnp.float32),   # h carry
            pltpu.VMEM((TB, H_pad), jnp.float32),   # c carry
        ],
    )

    out_p, h_last, c_last = pl.pallas_call(
        kernel,
        out_shape=out_shapes,
        grid_spec=grid_spec,
        compiler_params=pltpu.CompilerParams(
            dimension_semantics=("parallel", "arbitrary")),  # batch parallel, time serial
        # TODO(synk): for very large H on v7x, put W_hh in pl.ANY + one-time copy
        # (or pl.Buffered(1)) and set vmem_limit_bytes to avoid the 64 MiB cap.
    )(gx, h0_p, c0_p, whh_p)

    # ---- strip padding, back to batch_first -------------------------------
    out = jnp.transpose(out_p[:T, :B, :H], (1, 0, 2))        # (B, T, H)
    hidden_out = (h_last[:B, :H][None], c_last[:B, :H][None])  # (1, B, H) each
    return out, hidden_in, hidden_out


# ---------------------------------------------------------------------------
# Pure-JAX reference mirroring the PyTorch module (for correctness check).
# ---------------------------------------------------------------------------
def _reference_forward(x, params, hidden_in):
    H = params["W_l"].shape[0]
    h0, c0 = hidden_in
    y = jnp.maximum(jnp.einsum("btd,hd->bth", x, params["W_l"]) + params["b_l"], 0.0)

    def step(carry, y_t):
        h, c = carry
        gates = (y_t @ params["W_ih"].T + h @ params["W_hh"].T
                 + params["b_ih"] + params["b_hh"])
        i = jax.nn.sigmoid(gates[:, 0 * H:1 * H])
        f = jax.nn.sigmoid(gates[:, 1 * H:2 * H])
        g = jnp.tanh(gates[:, 2 * H:3 * H])
        o = jax.nn.sigmoid(gates[:, 3 * H:4 * H])
        c_new = f * c + i * g
        h_new = o * jnp.tanh(c_new)
        return (h_new, c_new), h_new

    (h_T, c_T), outs = jax.lax.scan(step, (h0[0], c0[0]), jnp.transpose(y, (1, 0, 2)))
    return jnp.transpose(outs, (1, 0, 2)), (h_T[None], c_T[None])


def init_params(key, d_in, d_hidden):
    ks = jax.random.split(key, 6)
    s = 1.0 / jnp.sqrt(d_hidden)
    return {
        "W_l": jax.random.uniform(ks[0], (d_hidden, d_in), jnp.float32, -s, s),
        "b_l": jax.random.uniform(ks[1], (d_hidden,), jnp.float32, -s, s),
        "W_ih": jax.random.uniform(ks[2], (4 * d_hidden, d_hidden), jnp.float32, -s, s),
        "W_hh": jax.random.uniform(ks[3], (4 * d_hidden, d_hidden), jnp.float32, -s, s),
        "b_ih": jax.random.uniform(ks[4], (4 * d_hidden,), jnp.float32, -s, s),
        "b_hh": jax.random.uniform(ks[5], (4 * d_hidden,), jnp.float32, -s, s),
    }


if __name__ == "__main__":
    B, T, D_in, D_hidden = 2, 8, 16, 32

    key = jax.random.PRNGKey(0)
    k_x, k_p = jax.random.split(key)
    x = jax.random.normal(k_x, (B, T, D_in), jnp.float32)
    params = init_params(k_p, D_in, D_hidden)

    ref_out, (ref_h, ref_c) = _reference_forward(x, params,
                                                 (jnp.zeros((1, B, D_hidden), jnp.float32),
                                                  jnp.zeros((1, B, D_hidden), jnp.float32)))

    # f32-weight path: tight check against the reference.
    out32, hidden_in, hidden_out32 = mlp_lstm_forward(x, params, hidden_in=None,
                                                      weight_dtype=jnp.float32)
    jax.block_until_ready((out32, hidden_out32))
    assert jnp.allclose(out32, ref_out, atol=1e-4, rtol=1e-4)
    assert jnp.allclose(hidden_out32[0], ref_h, atol=1e-4, rtol=1e-4)
    assert jnp.allclose(hidden_out32[1], ref_c, atol=1e-4, rtol=1e-4)

    # bf16-weight path (MXU-friendly default): looser tolerance.
    out16, _, hidden_out16 = mlp_lstm_forward(x, params, hidden_in=None,
                                              weight_dtype=jnp.bfloat16)
    jax.block_until_ready((out16, hidden_out16))
    assert jnp.allclose(out16, ref_out, atol=5e-2, rtol=5e-2)
    assert jnp.allclose(hidden_out16[0], ref_h, atol=5e-2, rtol=5e-2)
    assert jnp.allclose(hidden_out16[1], ref_c, atol=5e-2, rtol=5e-2)

    print("KERNEL_OK")
</pallas_src>

<mosaic_0001>
module attributes {stable_mosaic.version = 11 : i64} {
  func.func @_proj_kernel(%arg0: i32, %arg1: memref<64x16xf32, #tpu.memory_space<vmem>>, %arg2: memref<16x128xf32, #tpu.memory_space<vmem>>, %arg3: memref<1x128xf32, #tpu.memory_space<vmem>>, %arg4: memref<128x512xf32, #tpu.memory_space<vmem>>, %arg5: memref<1x512xf32, #tpu.memory_space<vmem>>, %arg6: memref<64x512xf32, #tpu.memory_space<vmem>>) attributes {dimension_semantics = [#tpu.dimension_semantics<parallel>], iteration_bounds = array<i64: 1>, scalar_prefetch = 0 : i64, scratch_operands = 0 : i64, tpu.core_type = #tpu.core_type<tc>, window_params = [{transform_indices = @transform_0, window_bounds = array<i64: 64, 16>}, {pipeline_mode = #tpu.pipeline_mode<synchronous>, transform_indices = @transform_1, window_bounds = array<i64: 16, 128>}, {pipeline_mode = #tpu.pipeline_mode<synchronous>, transform_indices = @transform_2, window_bounds = array<i64: 1, 128>}, {pipeline_mode = #tpu.pipeline_mode<synchronous>, transform_indices = @transform_3, window_bounds = array<i64: 128, 512>}, {pipeline_mode = #tpu.pipeline_mode<synchronous>, transform_indices = @transform_4, window_bounds = array<i64: 1, 512>}, {transform_indices = @transform_5, window_bounds = array<i64: 64, 512>}]} {
    %c0 = arith.constant 0 : index
    %c0_0 = arith.constant 0 : index
    %0 = vector.load %arg1[%c0, %c0_0] : memref<64x16xf32, #tpu.memory_space<vmem>>, vector<64x16xf32>
    %c0_1 = arith.constant 0 : index
    %c0_2 = arith.constant 0 : index
    %1 = vector.load %arg2[%c0_1, %c0_2] : memref<16x128xf32, #tpu.memory_space<vmem>>, vector<16x128xf32>
    %cst = arith.constant dense<0.000000e+00> : vector<64x128xf32>
    %2 = tpu.matmul %0, %1, %cst {dimension_numbers = #tpu.dot_dimension_numbers<[1], [0], [0], [1], [0, 0, 1, 1], [], []>} : vector<64x16xf32>, vector<16x128xf32>, vector<64x128xf32> -> vector<64x128xf32>
    %c0_3 = arith.constant 0 : index
    %c0_4 = arith.constant 0 : index
    %3 = vector.load %arg3[%c0_3, %c0_4] : memref<1x128xf32, #tpu.memory_space<vmem>>, vector<1x128xf32>
    %4 = vector.broadcast %3 : vector<1x128xf32> to vector<64x128xf32>
    %5 = arith.addf %2, %4 : vector<64x128xf32>
    %cst_5 = arith.constant 0.000000e+00 : f32
    %6 = vector.broadcast %cst_5 : f32 to vector<64x128xf32>
    %7 = arith.maximumf %5, %6 : vector<64x128xf32>
    %c0_6 = arith.constant 0 : index
    %c0_7 = arith.constant 0 : index
    %8 = vector.load %arg4[%c0_6, %c0_7] : memref<128x512xf32, #tpu.memory_space<vmem>>, vector<128x512xf32>
    %cst_8 = arith.constant dense<0.000000e+00> : vector<64x512xf32>
    %9 = tpu.matmul %7, %8, %cst_8 {dimension_numbers = #tpu.dot_dimension_numbers<[1], [0], [0], [1], [0, 0, 1, 1], [], []>} : vector<64x128xf32>, vector<128x512xf32>, vector<64x512xf32> -> vector<64x512xf32>
    %c0_9 = arith.constant 0 : index
    %c0_10 = arith.constant 0 : index
    %10 = vector.load %arg5[%c0_9, %c0_10] : memref<1x512xf32, #tpu.memory_space<vmem>>, vector<1x512xf32>
    %11 = vector.broadcast %10 : vector<1x512xf32> to vector<64x512xf32>
    %12 = arith.addf %9, %11 : vector<64x512xf32>
    %c0_11 = arith.constant 0 : index
    %c0_12 = arith.constant 0 : index
    %13 = vector.load %arg6[%c0_11, %c0_12] : memref<64x512xf32, #tpu.memory_space<vmem>>, vector<64x512xf32>
    tpu.vector_store %arg6[%c0_11, %c0_12], %12 {strides = array<i32>} : memref<64x512xf32, #tpu.memory_space<vmem>>, vector<64x512xf32>,
    return
  }
  func.func @transform_0(%arg0: i32) -> (i32, i32) {
    %c0_i32 = arith.constant 0 : i32
    %c0_i32_0 = arith.constant 0 : i32
    return %arg0, %c0_i32 : i32, i32
  }
  func.func @transform_1(%arg0: i32) -> (i32, i32) {
    %c0_i32 = arith.constant 0 : i32
    %c0_i32_0 = arith.constant 0 : i32
    %c0_i32_1 = arith.constant 0 : i32
    return %c0_i32, %c0_i32_0 : i32, i32
  }
  func.func @transform_2(%arg0: i32) -> (i32, i32) {
    %c0_i32 = arith.constant 0 : i32
    %c0_i32_0 = arith.constant 0 : i32
    %c0_i32_1 = arith.constant 0 : i32
    return %c0_i32, %c0_i32_0 : i32, i32
  }
  func.func @transform_3(%arg0: i32) -> (i32, i32) {
    %c0_i32 = arith.constant 0 : i32
    %c0_i32_0 = arith.constant 0 : i32
    %c0_i32_1 = arith.constant 0 : i32
    return %c0_i32, %c0_i32_0 : i32, i32
  }
  func.func @transform_4(%arg0: i32) -> (i32, i32) {
    %c0_i32 = arith.constant 0 : i32
    %c0_i32_0 = arith.constant 0 : i32
    %c0_i32_1 = arith.constant 0 : i32
    return %c0_i32, %c0_i32_0 : i32, i32
  }
  func.func @transform_5(%arg0: i32) -> (i32, i32) {
    %c0_i32 = arith.constant 0 : i32
    %c0_i32_0 = arith.constant 0 : i32
    return %arg0, %c0_i32 : i32, i32
  }
}

</mosaic_0001>

<bundles_post_ra>
// kernel: tpu_custom_call.1
= control target key start
LH: loop header
LB: loop body
LE: loop exit
PB: predicated region body
PF: predicated region fallthrough
CT: control target
= control target key end

     0   :  { %10 = vsyncpa [#allocation3], 0  ;;  %s856_s0 = inlined_call_operand.vmem [shape: f32[64,16], index: 0, kind: input, shape index: {}]   ;;  %s857_s1 = inlined_call_operand.vmem [shape: f32[16,128], index: 1, kind: input, shape index: {}]   ;;  %s858_s2 = inlined_call_operand.vmem [shape: f32[1,128], index: 2, kind: input, shape index: {}]   ;;  %s859_s3 = inlined_call_operand.hbm [shape: f32[128,512], index: 3, kind: input, shape index: {}]   ;;  %s860_s4 = inlined_call_operand.vmem [shape: f32[1,512], index: 4, kind: input, shape index: {}]   ;;  %s861_s5 = inlined_call_operand.hbm [shape: f32[64,512], index: 5, kind: output, shape index: {}]  }
   0x1   :  { %11 = vsyncpa [#allocation4], 0  ;;  %s707_s18 = smov [#allocation2]   ;;  %s659_s22 = scalar_lea.hbm %s859_s3, 8192 }
   0x2   :  { %s23_s19 = sshll.u32 %s707_s18, 4  ;;  %p660_p0 = scmp.ne.s32.totalorder %s859_s3, %s659_s22  ;;  %s24_s19 = int_to_ptr.vmem [resolvable:$true] %s23_s19 }
   0x3   :  { %p663_p1 = scmp.lt.u32.totalorder %s659_s22, %s859_s3 }
   0x5   :  { %p665_p2 = pnand %p663_p1, %p660_p0 }
   0x7   :  { %668 = shalt.err (!%p665_p2)
}
   0x8   :  { %s669_s27 = scalar_lea.vmem %s24_s19, 8192  ;;  %p674_p4 = scmp.lt.s32.totalorder %s24_s19, %s24_s19 }
   0x9   :  { %p670_p3 = scmp.ne.s32.totalorder %s24_s19, %s669_s27  ;;  %p675_p5 = scmp.lt.s32.totalorder %s669_s27, %s669_s27 }
   0xb   :  { %p676_p6 = por %p675_p5, %p674_p4 }
   0xd   :  { %p677_p7 = pnand %p676_p6, %p670_p3 }
   0xf   :  { %680 = shalt.err (!%p677_p7)
}
  0x10   :  { %s708_s28 = smov 512   ;;  %s709_s29 = smov 32  }
  0x11   :  { %29 = dma.hbm_to_vmem [thread:$0]  %s859_s3, 8192, %s24_s19, [#allocation3], %s708_s28, %s708_s28, %s709_s29  }
  0x12   :  { %703 = dma.done.wait [#allocation3], 8192  }
  0x13   :  { %704 = vsyncadd [#allocation3], 4294959104  ;;  %vm52_vm0 = vcmask 130048   ;;  %v43_v0 = vld [vmem:[%s857_s1] sm:$0xff]  ;;  %v44_v1 = vld [vmem:[%s857_s1 + $0x8] sm:$0xff] }
  0x14   :  { %v35_v2 = vld [vmem:[%s856_s0] sm:$0xff]  ;;  %v586_v3 = vpack.c.bf16 %v44_v1, %v43_v0  ;;  %v36_v4 = vld [vmem:[%s856_s0 + $0x8] sm:$0xff]  ;;  %v37_v5 = vld [vmem:[%s856_s0 + $0x10] sm:$0xff] }
  0x15   :  { %574 = vmatprep.mubr.msk.f32.mxu0 %vm52_vm0, %v35_v2  ;;  %v191_v6 = vld [vmem:[#allocation2 + $0x8] sm:$0xff]  ;;  %v193_v9 = vld [vmem:[#allocation2 + $0x18] sm:$0xff]  ;;  %v190_v11 = vld [vmem:[#allocation2] sm:$0xff] }
  0x16   :  { %587 = vmatprep.subr.bf16.mxu0 %v586_v3  ;;  %v195_v7 = vld [vmem:[#allocation2 + $0x28] sm:$0xff]  ;;  %v197_v10 = vld [vmem:[#allocation2 + $0x38] sm:$0xff]  ;;  %v194_v13 = vld [vmem:[#allocation2 + $0x20] sm:$0xff] }
  0x17   :  { %589 = vmatpush3.bf16.msra.mxu0 %v586_v3  ;;  %v590_v8 = vpack.c.bf16 %v195_v7, %v191_v6  ;;  %v622_v12 = vpack.c.bf16 %v197_v10, %v193_v9  ;;  %v192_v14 = vld [vmem:[#allocation2 + $0x10] sm:$0xff]  ;;  %v38_v16 = vld [vmem:[%s856_s0 + $0x18] sm:$0xff]  ;;  %v592_v17 = vpack.c.bf16 %v194_v13, %v190_v11  ;;  %v199_v19 = vld [vmem:[#allocation2 + $0x48] sm:$0xff] }
  0x18   :  { %v196_v15 = vld [vmem:[#allocation2 + $0x30] sm:$0xff]  ;;  %v203_v20 = vld [vmem:[#allocation2 + $0x68] sm:$0xff]  ;;  %v201_v21 = vld [vmem:[#allocation2 + $0x58] sm:$0xff] }
  0x19   :  { %591 = vmatprep.subr.bf16.mxu1 %v590_v8  ;;  %v624_v18 = vpack.c.bf16 %v196_v15, %v192_v14  ;;  %v39_v22 = vld [vmem:[%s856_s0 + $0x20] sm:$0xff]  ;;  %623 = vmatprep.subr.bf16.mxu0 %v622_v12  ;;  %v594_v23 = vpack.c.bf16 %v203_v20, %v199_v19  ;;  %v205_v24 = vld [vmem:[#allocation2 + $0x78] sm:$0xff]  ;;  %v200_v29 = vld [vmem:[#allocation2 + $0x50] sm:$0xff] }
  0x1a   :  { %575 = vmatmul.mubr.msk.f32.vlgmr.msra.gmra.mrb[0].mxu0 %vm52_vm0, %v36_v4  ;;  %v198_v25 = vld [vmem:[#allocation2 + $0x40] sm:$0xff]  ;;  %593 = vmatpush1.bf16.msra.mxu1 %v592_v17  ;;  %v626_v27 = vpack.c.bf16 %v205_v24, %v201_v21  ;;  %v204_v30 = vld [vmem:[#allocation2 + $0x70] sm:$0xff]  ;;  %v207_v31 = vld [vmem:[#allocation2 + $0x88] sm:$0xff] }
  0x1b   :  { %v202_v26 = vld [vmem:[#allocation2 + $0x60] sm:$0xff]  ;;  %577 = vmatprep.mubr.msk.f32.mxu0 %vm52_vm0, %v37_v5  ;;  %625 = vmatpush1.bf16.msra.mxu0 %v624_v18  ;;  %v628_v32 = vpack.c.bf16 %v204_v30, %v200_v29  ;;  %v211_v33 = vld [vmem:[#allocation2 + $0xa8] sm:$0xff]  ;;  %v209_v34 = vld [vmem:[#allocation2 + $0x98] sm:$0xff] }
  0x1c   :  { %v596_v28 = vpack.c.bf16 %v202_v26, %v198_v25  ;;  %595 = vmatprep.subr.bf16.mxu1 %v594_v23  ;;  %v213_v35 = vld [vmem:[#allocation2 + $0xb8] sm:$0xff]  ;;  %v40_v36 = vld [vmem:[%s856_s0 + $0x28] sm:$0xff]  ;;  %627 = vmatprep.subr.bf16.mxu0 %v626_v27  ;;  %v598_v37 = vpack.c.bf16 %v211_v33, %v207_v31  ;;  %v206_v39 = vld [vmem:[#allocation2 + $0x80] sm:$0xff] }
  0x1d   :  { %v630_v38 = vpack.c.bf16 %v213_v35, %v209_v34  ;;  %v210_v40 = vld [vmem:[#allocation2 + $0xa0] sm:$0xff]  ;;  %v208_v41 = vld [vmem:[#allocation2 + $0x90] sm:$0xff]  ;;  %v215_v43 = vld [vmem:[#allocation2 + $0xc8] sm:$0xff] }
  0x1e   :  { %578 = vmatmul.mubr.msk.f32.gmra.mrb[2].mxu0 %vm52_vm0, %v38_v16  ;;  %v212_v42 = vld [vmem:[#allocation2 + $0xb0] sm:$0xff]  ;;  %v219_v44 = vld [vmem:[#allocation2 + $0xe8] sm:$0xff]  ;;  %597 = vmatpush1.bf16.msra.mxu1 %v596_v28  ;;  %v600_v46 = vpack.c.bf16 %v210_v40, %v206_v39  ;;  %v217_v47 = vld [vmem:[#allocation2 + $0xd8] sm:$0xff] }
  0x1f   :  { %580 = vmatprep.mubr.msk.f32.mxu0 %vm52_vm0, %v39_v22  ;;  %v41_v45 = vld [vmem:[%s856_s0 + $0x30] sm:$0xff]  ;;  %v221_v48 = vld [vmem:[#allocation2 + $0xf8] sm:$0xff]  ;;  %629 = vmatpush1.bf16.msra.mxu0 %v628_v32  ;;  %v632_v49 = vpack.c.bf16 %v212_v42, %v208_v41  ;;  %v602_v50 = vpack.c.bf16 %v219_v44, %v215_v43  ;;  %v214_v51 = vld [vmem:[#allocation2 + $0xc0] sm:$0xff]  ;;  %v710_v43 = vmov 0.0  }
  0x20   :  { %599 = vmatprep.subr.bf16.mxu1 %v598_v37  ;;  %v218_v52 = vld [vmem:[#allocation2 + $0xe0] sm:$0xff]  ;;  %v216_v53 = vld [vmem:[#allocation2 + $0xd0] sm:$0xff]  ;;  %631 = vmatprep.subr.bf16.mxu0 %v630_v38  ;;  %v634_v54 = vpack.c.bf16 %v221_v48, %v217_v47  ;;  %v223_v56 = vld [vmem:[#allocation2 + $0x108] sm:$0xff] }
  0x21   :  { %v220_v55 = vld [vmem:[#allocation2 + $0xf0] sm:$0xff]  ;;  %v227_v57 = vld [vmem:[#allocation2 + $0x128] sm:$0xff]  ;;  %v225_v58 = vld [vmem:[#allocation2 + $0x118] sm:$0xff]  ;;  %v604_v61 = vpack.c.bf16 %v218_v52, %v214_v51  ;;  %340 = vmatprep.mubr.f32.mxu1 %v710_v43 }
  0x22   :  { %581 = vmatmul.mubr.msk.f32.gmra.mrb[4].mxu0 %vm52_vm0, %v40_v36  ;;  %v229_v59 = vld [vmem:[#allocation2 + $0x138] sm:$0xff]  ;;  %601 = vmatpush1.bf16.msra.mxu1 %v600_v46  ;;  %v636_v62 = vpack.c.bf16 %v220_v55, %v216_v53  ;;  %v606_v63 = vpack.c.bf16 %v227_v57, %v223_v56  ;;  %v222_v0 = vld [vmem:[#allocation2 + $0x100] sm:$0xff]  ;;  %v224_v2 = vld [vmem:[#allocation2 + $0x110] sm:$0xff] }
  0x23   :  { %583 = vmatprep.mubr.msk.f32.mxu0 %vm52_vm0, %v41_v45  ;;  %v42_v60 = vld [vmem:[%s856_s0 + $0x38] sm:$0xff]  ;;  %633 = vmatpush1.bf16.msra.mxu0 %v632_v49  ;;  %v226_v1 = vld [vmem:[#allocation2 + $0x120] sm:$0xff]  ;;  %v638_v3 = vpack.c.bf16 %v229_v59, %v225_v58  ;;  %v228_v4 = vld [vmem:[#allocation2 + $0x130] sm:$0xff] }
  0x24   :  { %603 = vmatprep.subr.bf16.mxu1 %v602_v50  ;;  %635 = vmatprep.subr.bf16.mxu0 %v634_v54  ;;  %v231_v5 = vld [vmem:[#allocation2 + $0x148] sm:$0xff]  ;;  %v233_v7 = vld [vmem:[#allocation2 + $0x158] sm:$0xff]  ;;  %v608_v9 = vpack.c.bf16 %v226_v1, %v222_v0  ;;  %v640_v10 = vpack.c.bf16 %v228_v4, %v224_v2  ;;  %v230_v12 = vld [vmem:[#allocation2 + $0x140] sm:$0xff] }
  0x25   :  { %v235_v6 = vld [vmem:[#allocation2 + $0x168] sm:$0xff]  ;;  %v237_v8 = vld [vmem:[#allocation2 + $0x178] sm:$0xff]  ;;  %v234_v13 = vld [vmem:[#allocation2 + $0x160] sm:$0xff] }
  0x26   :  { %584 = vmatmul.mubr.msk.f32.gmra.mrb[6].mxu0 %vm52_vm0, %v42_v60  ;;  %605 = vmatpush1.bf16.msra.mxu1 %v604_v61  ;;  %v610_v11 = vpack.c.bf16 %v235_v6, %v231_v5  ;;  %v232_v14 = vld [vmem:[#allocation2 + $0x150] sm:$0xff]  ;;  %v642_v15 = vpack.c.bf16 %v237_v8, %v233_v7  ;;  %v239_v17 = vld [vmem:[#allocation2 + $0x188] sm:$0xff]  ;;  %v241_v19 = vld [vmem:[#allocation2 + $0x198] sm:$0xff]  ;;  %v612_v21 = vpack.c.bf16 %v234_v13, %v230_v12  ;;  %v256_v5 = vlaneseq }
  0x27   :  { %637 = vmatpush1.bf16.msra.mxu0 %v636_v62  ;;  %607 = vmatprep.subr.bf16.mxu1 %v606_v63  ;;  %v236_v16 = vld [vmem:[#allocation2 + $0x170] sm:$0xff]  ;;  %v243_v18 = vld [vmem:[#allocation2 + $0x1a8] sm:$0xff]  ;;  %v245_v20 = vld [vmem:[#allocation2 + $0x1b8] sm:$0xff] }
  0x28   :  { %639 = vmatprep.subr.bf16.mxu0 %v638_v3  ;;  %v644_v22 = vpack.c.bf16 %v236_v16, %v232_v14  ;;  %v614_v23 = vpack.c.bf16 %v243_v18, %v239_v17  ;;  %v238_v24 = vld [vmem:[#allocation2 + $0x180] sm:$0xff]  ;;  %v646_v26 = vpack.c.bf16 %v245_v20, %v241_v19  ;;  %v240_v27 = vld [vmem:[#allocation2 + $0x190] sm:$0xff]  ;;  %v247_v31 = vld [vmem:[#allocation2 + $0x1c8] sm:$0xff]  ;;  %453 = vmatprep.mubr.f32.mxu0 %v710_v43  ;;  %v257_v6 = vshrl.u32 %v256_v5, 7 }
  0x29   :  { %v242_v25 = vld [vmem:[#allocation2 + $0x1a0] sm:$0xff]  ;;  %v244_v28 = vld [vmem:[#allocation2 + $0x1b0] sm:$0xff]  ;;  %v251_v32 = vld [vmem:[#allocation2 + $0x1e8] sm:$0xff] }
  0x2a   :  { %609 = vmatpush1.bf16.msra.mxu1 %v608_v9  ;;  %v616_v29 = vpack.c.bf16 %v242_v25, %v238_v24  ;;  %v648_v30 = vpack.c.bf16 %v244_v28, %v240_v27  ;;  %v249_v33 = vld [vmem:[#allocation2 + $0x1d8] sm:$0xff]  ;;  %v618_v34 = vpack.c.bf16 %v251_v32, %v247_v31  ;;  %v246_v36 = vld [vmem:[#allocation2 + $0x1c0] sm:$0xff]  ;;  %v248_v39 = vld [vmem:[#allocation2 + $0x1d0] sm:$0xff]  ;;  %v258_v7 = vsub.s32 0, %v257_v6 }
  0x2b   :  { %641 = vmatpush1.bf16.msra.mxu0 %v640_v10  ;;  %611 = vmatprep.subr.bf16.mxu1 %v610_v11  ;;  %v253_v35 = vld [vmem:[#allocation2 + $0x1f8] sm:$0xff]  ;;  %v250_v38 = vld [vmem:[#allocation2 + $0x1e0] sm:$0xff]  ;;  %v252_v40 = vld [vmem:[#allocation2 + $0x1f0] sm:$0xff]  ;;  %v266_v8 = vsub.s32 2, %v257_v6  ;;  %v262_v10 = vsub.s32 1, %v257_v6  ;;  %v270_v11 = vsub.s32 3, %v257_v6 }
  0x2c   :  { %643 = vmatprep.subr.bf16.mxu0 %v642_v15  ;;  %v650_v37 = vpack.c.bf16 %v253_v35, %v249_v33  ;;  %v620_v41 = vpack.c.bf16 %v250_v38, %v246_v36  ;;  %v652_v42 = vpack.c.bf16 %v252_v40, %v248_v39  ;;  %v551_v44 = vld [vmem:[%s858_s2] ss:$0 sm:$0xff] }
  0x2d   :  { %v254_v9 = vld [vmem:[%s860_s4] sm:$0xf]  ;;  %s711_s4 = smov [#allocation5]  }
  0x2e   :  { %613 = vmatpush1.bf16.msra.mxu1 %v612_v21  ;;  %v801_v12 = vrot.slane %v254_v9, %v258_v7  ;;  %v803_v13 = vrot.slane %v254_v9, %v266_v8  ;;  %v805_v14 = vrot.slane %v254_v9, %v262_v10  ;;  %v807_v15 = vrot.slane %v254_v9, %v270_v11  ;;  %s539_s27 = sshll.u32 %s711_s4, 4  ;;  %s540_s27 = int_to_ptr.vmem [resolvable:$true] %s539_s27 }
  0x2f   :  { %645 = vmatpush1.bf16.msra.mxu0 %v644_v22  ;;  %615 = vmatprep.subr.bf16.mxu1 %v614_v23  ;;  %s681_s30 = scalar_lea.vmem %s540_s27, 4096  ;;  %p686_p9 = scmp.lt.s32.totalorder %s540_s27, %s540_s27 }
  0x30   :  { %647 = vmatprep.subr.bf16.mxu0 %v646_v26  ;;  %p682_p8 = scmp.ne.s32.totalorder %s540_s27, %s681_s30  ;;  %p687_p10 = scmp.lt.s32.totalorder %s681_s30, %s681_s30 }
  0x32   :  { %617 = vmatpush1.bf16.msra.mxu1 %v616_v29  ;;  %p688_p11 = por %p687_p10, %p686_p9 }
  0x33   :  { %649 = vmatpush1.bf16.msra.mxu0 %v648_v30  ;;  %619 = vmatprep.subr.bf16.mxu1 %v618_v34 }
  0x34   :  { %651 = vmatprep.subr.bf16.mxu0 %v650_v37  ;;  %p689_p12 = pnand %p688_p11, %p682_p8 }
  0x36   :  { %621 = vmatpush1.bf16.msra.mxu1 %v620_v41 }
  0x37   :  { %653 = vmatpush1.bf16.msra.mxu0 %v652_v42 }
  0xed   :  { %v576_v45 = vpop.f32.mrb[0].mxu0 }
  0xee   :  { %v143_v46 = vpop.f32.mrb[1].mxu0  ;;  %v149_v48 = vadd.f32 %v576_v45, %v551_v44 }
  0xef   :  { %v144_v47 = vadd.f32 %v551_v44, %v143_v46 }
  0xf0   :  { %v183_v53 = vmax.f32 %v149_v48, 0.0 }
  0xf1   :  { %v182_v49 = vmax.f32 %v144_v47, 0.0  ;;  %v579_v50 = vpop.f32.mrb[2].mxu0 }
  0xf2   :  { %v153_v51 = vpop.f32.mrb[3].mxu0  ;;  %v159_v57 = vadd.f32 %v579_v50, %v551_v44 }
  0xf3   :  { %341 = vmatmul.mubr.f32.vlgmr.msra.gmra.mrb[0].mxu1 %v182_v49  ;;  %454 = vmatmul.mubr.f32.vlgmr.msra.gmra.mrb[8].mxu0 %v182_v49  ;;  %v154_v52 = vadd.f32 %v551_v44, %v153_v51 }
  0xf4   :  { %346 = vmatprep.mubr.f32.mxu1 %v710_v43  ;;  %459 = vmatprep.mubr.f32.mxu0 %v710_v43  ;;  %v185_v61 = vmax.f32 %v159_v57, 0.0 }
  0xf5   :  { %v582_v54 = vpop.f32.mrb[4].mxu0  ;;  %v184_v56 = vmax.f32 %v154_v52, 0.0 }
  0xf6   :  { %v163_v55 = vpop.f32.mrb[5].mxu0  ;;  %v169_v63 = vadd.f32 %v582_v54, %v551_v44 }
  0xf7   :  { %347 = vmatmul.mubr.f32.gmra.mrb[2].mxu1 %v183_v53  ;;  %460 = vmatmul.mubr.f32.gmra.mrb[10].mxu0 %v183_v53  ;;  %v164_v60 = vadd.f32 %v551_v44, %v163_v55 }
  0xf8   :  { %352 = vmatprep.mubr.f32.mxu1 %v710_v43  ;;  %465 = vmatprep.mubr.f32.mxu0 %v710_v43  ;;  %v187_v1 = vmax.f32 %v169_v63, 0.0 }
  0xf9   :  { %v585_v58 = vpop.f32.mrb[6].mxu0  ;;  %v186_v62 = vmax.f32 %v164_v60, 0.0 }
  0xfa   :  { %v173_v59 = vpop.f32.mrb[7].mxu0  ;;  %v179_v3 = vadd.f32 %v585_v58, %v551_v44 }
  0xfb   :  { %353 = vmatmul.mubr.f32.gmra.mrb[4].mxu1 %v184_v56  ;;  %466 = vmatmul.mubr.f32.gmra.mrb[12].mxu0 %v184_v56  ;;  %v174_v0 = vadd.f32 %v551_v44, %v173_v59 }
  0xfc   :  { %358 = vmatprep.mubr.f32.mxu1 %v710_v43  ;;  %471 = vmatprep.mubr.f32.mxu0 %v710_v43  ;;  %v189_v4 = vmax.f32 %v179_v3, 0.0 }
  0xfd   :  { %v188_v2 = vmax.f32 %v174_v0, 0.0 }
  0xff   :  { %359 = vmatmul.mubr.f32.gmra.mrb[6].mxu1 %v185_v61  ;;  %472 = vmatmul.mubr.f32.gmra.mrb[14].mxu0 %v185_v61 }
 0x100   :  { %364 = vmatprep.mubr.f32.mxu1 %v710_v43  ;;  %477 = vmatprep.mubr.f32.mxu0 %v710_v43 }
 0x103   :  { %365 = vmatmul.mubr.f32.gmra.mrb[8].mxu1 %v186_v62  ;;  %478 = vmatmul.mubr.f32.gmra.mrb[16].mxu0 %v186_v62 }
 0x104   :  { %370 = vmatprep.mubr.f32.mxu1 %v710_v43  ;;  %483 = vmatprep.mubr.f32.mxu0 %v710_v43 }
 0x107   :  { %371 = vmatmul.mubr.f32.gmra.mrb[10].mxu1 %v187_v1  ;;  %484 = vmatmul.mubr.f32.gmra.mrb[18].mxu0 %v187_v1 }
 0x108   :  { %376 = vmatprep.mubr.f32.mxu1 %v710_v43  ;;  %489 = vmatprep.mubr.f32.mxu0 %v710_v43 }
 0x10b   :  { %377 = vmatmul.mubr.f32.gmra.mrb[12].mxu1 %v188_v2  ;;  %490 = vmatmul.mubr.f32.gmra.mrb[20].mxu0 %v188_v2 }
 0x10c   :  { %382 = vmatprep.mubr.f32.mxu1 %v710_v43  ;;  %495 = vmatprep.mubr.f32.mxu0 %v710_v43 }
 0x10f   :  { %383 = vmatmul.mubr.f32.gmra.mrb[14].mxu1 %v189_v4  ;;  %496 = vmatmul.mubr.f32.gmra.mrb[22].mxu0 %v189_v4 }
 0x1c6   :  { %v342_v16 = vpop.f32.mrb[0].mxu1  ;;  %v455_v17 = vpop.f32.mrb[8].mxu0 }
 0x1c7   :  { %v343_v18 = vadd.f32 %v342_v16, %v801_v12  ;;  %v456_v19 = vadd.f32 %v455_v17, %v803_v13  ;;  %v344_v20 = vpop.f32.mrb[1].mxu1  ;;  %v457_v21 = vpop.f32.mrb[9].mxu0 }
 0x1c8   :  { %v345_v22 = vadd.f32 %v344_v20, %v805_v14  ;;  %v458_v23 = vadd.f32 %v457_v21, %v807_v15 }
 0x1c9   :  { %502 = vst [vmem:[#allocation5] sm:$0xff] %v343_v18  ;;  %504 = vst [vmem:[#allocation5 + $0x10] sm:$0xff] %v456_v19 }
 0x1ca   :  { %503 = vst [vmem:[#allocation5 + $0x8] sm:$0xff] %v345_v22  ;;  %505 = vst [vmem:[#allocation5 + $0x18] sm:$0xff] %v458_v23  ;;  %v348_v24 = vpop.f32.mrb[2].mxu1  ;;  %v461_v25 = vpop.f32.mrb[10].mxu0 }
 0x1cb   :  { %v349_v26 = vadd.f32 %v348_v24, %v801_v12  ;;  %v462_v27 = vadd.f32 %v461_v25, %v803_v13  ;;  %v350_v28 = vpop.f32.mrb[3].mxu1  ;;  %v463_v29 = vpop.f32.mrb[11].mxu0 }
 0x1cc   :  { %v351_v30 = vadd.f32 %v350_v28, %v805_v14  ;;  %v464_v31 = vadd.f32 %v463_v29, %v807_v15 }
 0x1cd   :  { %506 = vst [vmem:[#allocation5 + $0x20] sm:$0xff] %v349_v26  ;;  %508 = vst [vmem:[#allocation5 + $0x30] sm:$0xff] %v462_v27 }
 0x1ce   :  { %507 = vst [vmem:[#allocation5 + $0x28] sm:$0xff] %v351_v30  ;;  %509 = vst [vmem:[#allocation5 + $0x38] sm:$0xff] %v464_v31  ;;  %v354_v32 = vpop.f32.mrb[4].mxu1  ;;  %v467_v33 = vpop.f32.mrb[12].mxu0 }
 0x1cf   :  { %v355_v34 = vadd.f32 %v354_v32, %v801_v12  ;;  %v468_v35 = vadd.f32 %v467_v33, %v803_v13  ;;  %v356_v36 = vpop.f32.mrb[5].mxu1  ;;  %v469_v37 = vpop.f32.mrb[13].mxu0 }
 0x1d0   :  { %v357_v38 = vadd.f32 %v356_v36, %v805_v14  ;;  %v470_v39 = vadd.f32 %v469_v37, %v807_v15 }
 0x1d1   :  { %510 = vst [vmem:[#allocation5 + $0x40] sm:$0xff] %v355_v34  ;;  %512 = vst [vmem:[#allocation5 + $0x50] sm:$0xff] %v468_v35 }
 0x1d2   :  { %511 = vst [vmem:[#allocation5 + $0x48] sm:$0xff] %v357_v38  ;;  %513 = vst [vmem:[#allocation5 + $0x58] sm:$0xff] %v470_v39  ;;  %v360_v40 = vpop.f32.mrb[6].mxu1  ;;  %v473_v41 = vpop.f32.mrb[14].mxu0 }
 0x1d3   :  { %v361_v42 = vadd.f32 %v360_v40, %v801_v12  ;;  %v474_v43 = vadd.f32 %v473_v41, %v803_v13  ;;  %v362_v44 = vpop.f32.mrb[7].mxu1  ;;  %v475_v45 = vpop.f32.mrb[15].mxu0 }
 0x1d4   :  { %v363_v46 = vadd.f32 %v362_v44, %v805_v14  ;;  %v476_v47 = vadd.f32 %v475_v45, %v807_v15 }
 0x1d5   :  { %514 = vst [vmem:[#allocation5 + $0x60] sm:$0xff] %v361_v42  ;;  %516 = vst [vmem:[#allocation5 + $0x70] sm:$0xff] %v474_v43 }
 0x1d6   :  { %515 = vst [vmem:[#allocation5 + $0x68] sm:$0xff] %v363_v46  ;;  %517 = vst [vmem:[#allocation5 + $0x78] sm:$0xff] %v476_v47  ;;  %v366_v48 = vpop.f32.mrb[8].mxu1  ;;  %v479_v49 = vpop.f32.mrb[16].mxu0 }
 0x1d7   :  { %v367_v50 = vadd.f32 %v366_v48, %v801_v12  ;;  %v480_v51 = vadd.f32 %v479_v49, %v803_v13  ;;  %v368_v52 = vpop.f32.mrb[9].mxu1  ;;  %v481_v53 = vpop.f32.mrb[17].mxu0 }
 0x1d8   :  { %v369_v54 = vadd.f32 %v368_v52, %v805_v14  ;;  %v482_v55 = vadd.f32 %v481_v53, %v807_v15 }
 0x1d9   :  { %518 = vst [vmem:[#allocation5 + $0x80] sm:$0xff] %v367_v50  ;;  %520 = vst [vmem:[#allocation5 + $0x90] sm:$0xff] %v480_v51 }
 0x1da   :  { %519 = vst [vmem:[#allocation5 + $0x88] sm:$0xff] %v369_v54  ;;  %521 = vst [vmem:[#allocation5 + $0x98] sm:$0xff] %v482_v55  ;;  %v372_v56 = vpop.f32.mrb[10].mxu1  ;;  %v485_v57 = vpop.f32.mrb[18].mxu0 }
 0x1db   :  { %v373_v58 = vadd.f32 %v372_v56, %v801_v12  ;;  %v486_v59 = vadd.f32 %v485_v57, %v803_v13  ;;  %v374_v60 = vpop.f32.mrb[11].mxu1  ;;  %v487_v61 = vpop.f32.mrb[19].mxu0 }
 0x1dc   :  { %v375_v62 = vadd.f32 %v374_v60, %v805_v14  ;;  %v488_v63 = vadd.f32 %v487_v61, %v807_v15 }
 0x1dd   :  { %522 = vst [vmem:[#allocation5 + $0xa0] sm:$0xff] %v373_v58  ;;  %524 = vst [vmem:[#allocation5 + $0xb0] sm:$0xff] %v486_v59 }
 0x1de   :  { %523 = vst [vmem:[#allocation5 + $0xa8] sm:$0xff] %v375_v62  ;;  %525 = vst [vmem:[#allocation5 + $0xb8] sm:$0xff] %v488_v63  ;;  %v378_v0 = vpop.f32.mrb[12].mxu1  ;;  %v491_v1 = vpop.f32.mrb[20].mxu0 }
 0x1df   :  { %v379_v2 = vadd.f32 %v378_v0, %v801_v12  ;;  %v492_v3 = vadd.f32 %v491_v1, %v803_v13  ;;  %v380_v4 = vpop.f32.mrb[13].mxu1  ;;  %v493_v5 = vpop.f32.mrb[21].mxu0 }
 0x1e0   :  { %v381_v6 = vadd.f32 %v380_v4, %v805_v14  ;;  %v494_v7 = vadd.f32 %v493_v5, %v807_v15 }
 0x1e1   :  { %526 = vst [vmem:[#allocation5 + $0xc0] sm:$0xff] %v379_v2  ;;  %528 = vst [vmem:[#allocation5 + $0xd0] sm:$0xff] %v492_v3 }
 0x1e2   :  { %527 = vst [vmem:[#allocation5 + $0xc8] sm:$0xff] %v381_v6  ;;  %529 = vst [vmem:[#allocation5 + $0xd8] sm:$0xff] %v494_v7  ;;  %v384_v8 = vpop.f32.mrb[14].mxu1  ;;  %v497_v9 = vpop.f32.mrb[22].mxu0 }
 0x1e3   :  { %v385_v10 = vadd.f32 %v384_v8, %v801_v12  ;;  %v498_v11 = vadd.f32 %v497_v9, %v803_v13  ;;  %v386_v16 = vpop.f32.mrb[15].mxu1  ;;  %v499_v17 = vpop.f32.mrb[23].mxu0 }
 0x1e4   :  { %v387_v18 = vadd.f32 %v386_v16, %v805_v14  ;;  %v500_v19 = vadd.f32 %v499_v17, %v807_v15 }
 0x1e5   :  { %530 = vst [vmem:[#allocation5 + $0xe0] sm:$0xff] %v385_v10  ;;  %532 = vst [vmem:[#allocation5 + $0xf0] sm:$0xff] %v498_v11 }
 0x1e6   :  { %531 = vst [vmem:[#allocation5 + $0xe8] sm:$0xff] %v387_v18  ;;  %533 = vst [vmem:[#allocation5 + $0xf8] sm:$0xff] %v500_v19 }
 0x1e7   :  { %692 = shalt.err (!%p689_p12)
}
 0x1e8   :  { %s693_s8 = scalar_lea.hbm %s861_s5, 4096 }
 0x1e9   :  { %p694_p13 = scmp.ne.s32.totalorder %s861_s5, %s693_s8  ;;  %p697_p0 = scmp.lt.u32.totalorder %s693_s8, %s861_s5 }
 0x1eb   :  { %p699_p1 = pnand %p697_p0, %p694_p13 }
 0x1ed   :  { %702 = shalt.err (!%p699_p1)
}
 0x1ee   :  { %545 = dma.vmem_to_hbm [thread:$0]  %s540_s27, 4096, %s861_s5, [#allocation4], %s708_s28, %s708_s28, %s709_s29  }
 0x1ef   :  { %705 = dma.done.wait [#allocation4], 4096  }
 0x1f0   :  { %706 = vsyncadd [#allocation4], 4294963200 }
 0x1f1   :  { %549 = vsyncpa [#allocation3], 1 }
 0x1f2   :  { %550 = vsyncpa [#allocation4], 1 }

</bundles_post_ra>
